<compile_context>
chip_gen: v7x
topology: tpu7x:2x2x1
jax: 0.10.0
libtpu: 0.0.40
codegen_flags: <defaults>
</compile_context>

<pallas_src>
import functools

import jax
import jax.numpy as jnp
import numpy as np
from jax.experimental import pallas as pl
from jax.experimental.pallas import tpu as pltpu


def _gat_decoder_kernel(x_ref, attw_ref, adj_ref, Wf_ref, bf_ref, o_ref, *,
                        heads, d_out):
    """One grid step == one block of Bblk batch elements.

    x_ref    : (Bblk, N, D_in)        f32 layer input
    attw_ref : (Bblk, H, N, N)        bf16 externally supplied attention logits
    adj_ref  : (Bblk, N, N)           f32 adjacency mask (>0 means edge)
    Wf_ref   : (D_in, 2*H*D_out)      fused [head-major projection | gate] weight
    bf_ref   : (1, 2*H*D_out)         fused [tiled head bias | gate bias]
    o_ref    : (Bblk, 1, N*H*D_out)   lane-dense output slab
    """
    bblk, n, d_in = x_ref.shape
    hd = heads * d_out

    x = x_ref[...]                                    # (Bblk, N, Din) f32
    x2d = x.reshape(bblk * n, d_in)                   # Bblk*N rows fill the MXU M dim

    # --- single fused MXU matmul: per-head projections + gate pre-activation ---
    # (kept f32 for exactness; with bf16 params feed bf16 LHS/weights here and
    #  keep preferred_element_type=f32 for the v6e/v7x bf16-MXU peak)
    proj = jnp.dot(x2d, Wf_ref[...], preferred_element_type=jnp.float32)  # (Bblk*N, 2*HD)
    h2d = proj[:, :hd]                                                    # head-major lanes
    gate = jax.nn.sigmoid(proj[:, hd:] + bf_ref[...][:, hd:])
    gate = gate.reshape(bblk, n, hd)

    # --- masked softmax, vectorized over all heads at once (exact divide) ---
    logits = attw_ref[...].astype(jnp.float32)                   # upcast bf16 -> f32
    mask = adj_ref[...] > 0                                       # (Bblk, N, N)
    logits = jnp.where(mask[:, None, :, :], logits, jnp.float32(-1e9))
    m = jnp.max(logits, axis=-1, keepdims=True)
    e = jnp.exp(logits - m)
    attn = e / jnp.sum(e, axis=-1, keepdims=True)                 # (Bblk, H, N, N)

    # --- neighbour aggregation: ONE batched contraction over folded (b, h) ---
    h3d = h2d.reshape(bblk, n, hd)
    h_heads = jnp.stack(
        [h3d[:, :, k * d_out:(k + 1) * d_out] for k in range(heads)],
        axis=1)                                                   # (Bblk, H, N, Dout)
    agg = jnp.einsum('gnm,gmd->gnd',
                     attn.reshape(bblk * heads, n, n),
                     h_heads.reshape(bblk * heads, n, d_out),
                     preferred_element_type=jnp.float32)          # (Bblk*H, N, Dout)
    agg = agg.reshape(bblk, heads, n, d_out)
    feat = jnp.concatenate([agg[:, k] for k in range(heads)], axis=-1)  # (Bblk, N, HD)

    # bias (reference placement: after aggregation), overflow-safe ELU
    feat = feat + bf_ref[...][:, :hd]
    feat = jnp.where(feat > 0, feat, jnp.exp(jnp.minimum(feat, 0.0)) - 1.0)

    # sigmoid-gated residual with the layer input
    out = gate * feat + (1.0 - gate) * x                          # (Bblk, N, HD)

    # lane-dense store: full-width (N*HD lanes) vst / dense output DMA
    o_ref[...] = out.reshape(bblk, 1, n * hd)


def prepare_gat_decoder_params(Wp, b, Wg, bg):
    """Build the fused weight/bias ONCE (not per forward call).

    Wp: (H, Din, Dout), b: (1, Dout), Wg: (Din, H*Dout), bg: (1, H*Dout)
    Returns (W_fused (Din, 2*H*Dout), b_fused (1, 2*H*Dout)).
    """
    H, Din, Dout = Wp.shape
    HD = H * Dout
    Wp_all = jnp.transpose(Wp, (1, 0, 2)).reshape(Din, HD)   # head-major output lanes
    b_tiled = jnp.tile(b, (1, H))                             # (1, HD)
    W_fused = jnp.concatenate([Wp_all, Wg], axis=1)           # (Din, 2*HD)
    b_fused = jnp.concatenate([b_tiled, bg], axis=1)          # (1, 2*HD)
    return W_fused, b_fused


def _choose_block_b(B, N, H, Din, HD, logits_itemsize=2):
    """Pick Bblk: >=256 rows per step if possible, >=2 grid steps (v7x 2 TCs),
    double-buffered blocks within a VMEM budget that also fits v7x."""
    def blocks_bytes(bb):
        per_step = bb * (H * N * N * logits_itemsize   # bf16 attention logits
                         + N * Din * 4                 # x
                         + N * N * 4                   # adj
                         + N * HD * 4)                 # output
        return 2 * per_step                            # pipeline double-buffering

    budget = 24 << 20          # conservative: leaves headroom on v7x (64 MiB phys)
    target_rows = 256          # fills the v6e/v7x 256-wide MXU M dimension

    best = 1
    for d in range(1, B + 1):
        if B % d != 0:
            continue
        if blocks_bytes(d) > budget:
            break
        if d > 1 and B >= 2 and (B // d) < 2:
            continue           # keep >=2 grid steps so v7x's 2nd core has work
        best = d
        if d * N >= target_rows:
            break
    return best, blocks_bytes(best)


def gat_decoder_layer(x, W, adj, W_fused, b_fused, *, heads, d_out, block_b=None):
    B, N, Din = x.shape
    HD = heads * d_out
    assert HD == Din, "gated residual requires H*D_out == D_in"
    assert W.shape == (B, heads, N, N) and adj.shape == (B, N, N)
    assert W_fused.shape == (Din, 2 * HD) and b_fused.shape == (1, 2 * HD)

    # Dominant HBM operand -> bf16 (upcast inside the kernel before the softmax).
    W_bf16 = W.astype(jnp.bfloat16)

    auto_bb, blk_bytes = _choose_block_b(B, N, heads, Din, HD,
                                         W_bf16.dtype.itemsize)
    if block_b is None:
        block_b = auto_bb
    assert B % block_b == 0
    grid_b = B // block_b

    weights_bytes = (Din * 2 * HD + 2 * HD) * 4
    vmem_limit = int(min(max(2 * (blk_bytes + weights_bytes), 32 << 20), 48 << 20))

    kernel = functools.partial(_gat_decoder_kernel, heads=heads, d_out=d_out)
    out_flat = pl.pallas_call(
        kernel,
        out_shape=jax.ShapeDtypeStruct((B, 1, N * HD), jnp.float32),
        grid_spec=pltpu.PrefetchScalarGridSpec(
            num_scalar_prefetch=0,
            grid=(grid_b,),
            in_specs=[
                pl.BlockSpec((block_b, N, Din), lambda bi: (bi, 0, 0)),
                pl.BlockSpec((block_b, heads, N, N), lambda bi: (bi, 0, 0, 0)),
                pl.BlockSpec((block_b, N, N), lambda bi: (bi, 0, 0)),
                # fused weight / bias: constant index maps -> DMA'd once, resident
                pl.BlockSpec((Din, 2 * HD), lambda bi: (0, 0)),
                pl.BlockSpec((1, 2 * HD), lambda bi: (0, 0)),
            ],
            out_specs=pl.BlockSpec((block_b, 1, N * HD), lambda bi: (bi, 0, 0)),
        ),
        compiler_params=pltpu.CompilerParams(
            dimension_semantics=("parallel",),
            vmem_limit_bytes=vmem_limit),
    )(x, W_bf16, adj, W_fused, b_fused)
    return out_flat.reshape(B, N, HD)


def gatvae_decoder_forward(doc_sents_h, doc_len, adj, W, fused_params, *,
                           heads, gat_feat_dim):
    """Mirrors GATVAEdecoder.forward: a single GATdecoderlayer application."""
    batch, max_doc_len, _ = doc_sents_h.shape
    try:
        assert int(np.max(np.asarray(doc_len))) == max_doc_len
    except (jax.errors.TracerArrayConversionError,
            jax.errors.ConcretizationTypeError):
        pass  # doc_len is traced under jit; it is otherwise unused (matches ref)
    W_fused, b_fused = fused_params
    return gat_decoder_layer(doc_sents_h, W, adj, W_fused, b_fused,
                             heads=heads, d_out=gat_feat_dim)


def _reference(x, W, adj, Wp, b, Wg, bg):
    h = jnp.einsum('bnd,hdo->bhno', x, Wp)
    logits = jnp.where(adj[:, None] > 0, W, -1e9)
    attn = jax.nn.softmax(logits, axis=-1)
    out = jnp.einsum('bhnm,bhmo->bhno', attn, h) + b[0]
    B_, H_, N_, Do = out.shape
    out = out.transpose(0, 2, 1, 3).reshape(B_, N_, H_ * Do)
    out = jnp.where(out > 0, out, jnp.exp(jnp.minimum(out, 0.0)) - 1.0)
    gate = jax.nn.sigmoid(x @ Wg + bg[0])
    return gate * out + (1.0 - gate) * x


if __name__ == "__main__":
    # config: emb_dim=32, multihead=4, gat_feat_dim=8  (4*8 == 32 for residual)
    B, N, D_in, H, D_out = 2, 8, 32, 4, 8

    key = jax.random.PRNGKey(0)
    k_x, k_w, k_adj, k_wp, k_b, k_wg, k_bg = jax.random.split(key, 7)

    doc_sents_h = jax.random.normal(k_x, (B, N, D_in), dtype=jnp.float32)
    W_attn = jax.random.normal(k_w, (B, H, N, N), dtype=jnp.float32)
    adj = (jax.random.uniform(k_adj, (B, N, N)) > 0.3).astype(jnp.float32)
    adj = jnp.maximum(adj, jnp.eye(N, dtype=jnp.float32)[None])   # self-loops
    doc_len = np.full((B,), N, dtype=np.int32)

    # deterministic parameter init (xavier-ish scaling)
    Wp = jax.random.normal(k_wp, (H, D_in, D_out), dtype=jnp.float32) * (1.0 / np.sqrt(D_in))
    b = jax.random.normal(k_b, (1, D_out), dtype=jnp.float32) * 0.01
    Wg = jax.random.normal(k_wg, (D_in, H * D_out), dtype=jnp.float32) * (1.0 / np.sqrt(D_in))
    bg = jax.random.normal(k_bg, (1, H * D_out), dtype=jnp.float32) * 0.01

    fused_params = prepare_gat_decoder_params(Wp, b, Wg, bg)   # done once

    out = gatvae_decoder_forward(doc_sents_h, doc_len, adj, W_attn, fused_params,
                                 heads=H, gat_feat_dim=D_out)
    out = jax.block_until_ready(out)

    # Reference uses the same bf16-quantized logits as the kernel (the bf16
    # cast is a deliberate bandwidth optimization applied at the boundary);
    # tolerance covers TPU default-precision f32 matmul paths.
    W_q = W_attn.astype(jnp.bfloat16).astype(jnp.float32)
    ref = _reference(doc_sents_h, W_q, adj, Wp, b, Wg, bg)
    np.testing.assert_allclose(np.asarray(out), np.asarray(ref), rtol=2e-3, atol=2e-3)

    print("KERNEL_OK")
</pallas_src>

<mosaic_0001>
module attributes {stable_mosaic.version = 11 : i64} {
  func.func @_gat_decoder_kernel(%arg0: i32, %arg1: memref<1x8x32xf32, #tpu.memory_space<vmem>>, %arg2: memref<1x4x8x8xbf16, #tpu.memory_space<vmem>>, %arg3: memref<1x8x8xf32, #tpu.memory_space<vmem>>, %arg4: memref<32x64xf32, #tpu.memory_space<vmem>>, %arg5: memref<1x64xf32, #tpu.memory_space<vmem>>, %arg6: memref<1x1x256xf32, #tpu.memory_space<vmem>>) attributes {dimension_semantics = [#tpu.dimension_semantics<parallel>], iteration_bounds = array<i64: 2>, scalar_prefetch = 0 : i64, scratch_operands = 0 : i64, tpu.core_type = #tpu.core_type<tc>, window_params = [{transform_indices = @transform_0, window_bounds = array<i64: 1, 8, 32>}, {transform_indices = @transform_1, window_bounds = array<i64: 1, 4, 8, 8>}, {transform_indices = @transform_2, window_bounds = array<i64: 1, 8, 8>}, {pipeline_mode = #tpu.pipeline_mode<synchronous>, transform_indices = @transform_3, window_bounds = array<i64: 32, 64>}, {pipeline_mode = #tpu.pipeline_mode<synchronous>, transform_indices = @transform_4, window_bounds = array<i64: 1, 64>}, {transform_indices = @transform_5, window_bounds = array<i64: 1, 1, 256>}]} {
    %c0 = arith.constant 0 : index
    %c0_0 = arith.constant 0 : index
    %c0_1 = arith.constant 0 : index
    %0 = vector.load %arg1[%c0, %c0_0, %c0_1] : memref<1x8x32xf32, #tpu.memory_space<vmem>>, vector<1x8x32xf32>
    %1 = vector.shape_cast %0 : vector<1x8x32xf32> to vector<8x32xf32>
    %c0_2 = arith.constant 0 : index
    %c0_3 = arith.constant 0 : index
    %2 = vector.load %arg4[%c0_2, %c0_3] : memref<32x64xf32, #tpu.memory_space<vmem>>, vector<32x64xf32>
    %cst = arith.constant dense<0.000000e+00> : vector<8x64xf32>
    %3 = tpu.matmul %1, %2, %cst {dimension_numbers = #tpu.dot_dimension_numbers<[1], [0], [0], [1], [0, 0, 1, 1], [], []>} : vector<8x32xf32>, vector<32x64xf32>, vector<8x64xf32> -> vector<8x64xf32>
    %4 = vector.extract_strided_slice %3 {offsets = [0, 0], sizes = [8, 32], strides = [1, 1]} : vector<8x64xf32> to vector<8x32xf32>
    %5 = vector.extract_strided_slice %3 {offsets = [0, 32], sizes = [8, 32], strides = [1, 1]} : vector<8x64xf32> to vector<8x32xf32>
    %c0_4 = arith.constant 0 : index
    %c0_5 = arith.constant 0 : index
    %6 = vector.load %arg5[%c0_4, %c0_5] : memref<1x64xf32, #tpu.memory_space<vmem>>, vector<1x64xf32>
    %7 = vector.extract_strided_slice %6 {offsets = [0, 32], sizes = [1, 32], strides = [1, 1]} : vector<1x64xf32> to vector<1x32xf32>
    %8 = vector.broadcast %7 : vector<1x32xf32> to vector<8x32xf32>
    %9 = arith.addf %5, %8 : vector<8x32xf32>
    %10 = arith.negf %9 : vector<8x32xf32>
    %11 = math.exp %10 : vector<8x32xf32>
    %cst_6 = arith.constant 1.000000e+00 : f32
    %12 = vector.broadcast %cst_6 : f32 to vector<8x32xf32>
    %13 = arith.addf %12, %11 : vector<8x32xf32>
    %14 = arith.divf %12, %13 : vector<8x32xf32>
    %15 = vector.shape_cast %14 : vector<8x32xf32> to vector<1x8x32xf32>
    %c0_7 = arith.constant 0 : index
    %c0_8 = arith.constant 0 : index
    %c0_9 = arith.constant 0 : index
    %c0_10 = arith.constant 0 : index
    %16 = vector.load %arg2[%c0_7, %c0_8, %c0_9, %c0_10] : memref<1x4x8x8xbf16, #tpu.memory_space<vmem>>, vector<1x4x8x8xbf16>
    %17 = arith.extf %16 : vector<1x4x8x8xbf16> to vector<1x4x8x8xf32>
    %c0_11 = arith.constant 0 : index
    %c0_12 = arith.constant 0 : index
    %c0_13 = arith.constant 0 : index
    %18 = vector.load %arg3[%c0_11, %c0_12, %c0_13] : memref<1x8x8xf32, #tpu.memory_space<vmem>>, vector<1x8x8xf32>
    %cst_14 = arith.constant 0.000000e+00 : f32
    %19 = vector.broadcast %cst_14 : f32 to vector<1x8x8xf32>
    %20 = arith.cmpf ogt, %18, %19 : vector<1x8x8xf32>
    %21 = vector.shape_cast %20 : vector<1x8x8xi1> to vector<1x1x8x8xi1>
    %cst_15 = arith.constant -1.000000e+09 : f32
    %22 = vector.shape_cast %21 : vector<1x1x8x8xi1> to vector<1x1x8x8xi1>
    %23 = vector.broadcast %22 : vector<1x1x8x8xi1> to vector<1x4x8x8xi1>
    %24 = vector.broadcast %cst_15 : f32 to vector<1x4x8x8xf32>
    %25 = arith.select %23, %17, %24 : vector<1x4x8x8xi1>, vector<1x4x8x8xf32>
    %cst_16 = arith.constant dense<0xFF800000> : vector<1x4x8xf32>
    %26 = vector.multi_reduction <maximumf>, %25, %cst_16 [3] : vector<1x4x8x8xf32> to vector<1x4x8xf32>
    %27 = vector.shape_cast %26 : vector<1x4x8xf32> to vector<1x4x8x1xf32>
    %28 = vector.broadcast %27 : vector<1x4x8x1xf32> to vector<1x4x8x8xf32>
    %29 = arith.subf %25, %28 : vector<1x4x8x8xf32>
    %30 = math.exp %29 : vector<1x4x8x8xf32>
    %cst_17 = arith.constant dense<0.000000e+00> : vector<1x4x8xf32>
    %31 = vector.multi_reduction <add>, %30, %cst_17 [3] : vector<1x4x8x8xf32> to vector<1x4x8xf32>
    %32 = vector.shape_cast %31 : vector<1x4x8xf32> to vector<1x4x8x1xf32>
    %33 = vector.broadcast %32 : vector<1x4x8x1xf32> to vector<1x4x8x8xf32>
    %34 = arith.divf %30, %33 : vector<1x4x8x8xf32>
    %35 = vector.shape_cast %4 : vector<8x32xf32> to vector<1x8x32xf32>
    %36 = vector.extract_strided_slice %35 {offsets = [0, 0, 0], sizes = [1, 8, 8], strides = [1, 1, 1]} : vector<1x8x32xf32> to vector<1x8x8xf32>
    %37 = vector.extract_strided_slice %35 {offsets = [0, 0, 8], sizes = [1, 8, 8], strides = [1, 1, 1]} : vector<1x8x32xf32> to vector<1x8x8xf32>
    %38 = vector.extract_strided_slice %35 {offsets = [0, 0, 16], sizes = [1, 8, 8], strides = [1, 1, 1]} : vector<1x8x32xf32> to vector<1x8x8xf32>
    %39 = vector.extract_strided_slice %35 {offsets = [0, 0, 24], sizes = [1, 8, 8], strides = [1, 1, 1]} : vector<1x8x32xf32> to vector<1x8x8xf32>
    %40 = vector.shape_cast %36 : vector<1x8x8xf32> to vector<1x1x8x8xf32>
    %41 = vector.shape_cast %37 : vector<1x8x8xf32> to vector<1x1x8x8xf32>
    %42 = vector.shape_cast %38 : vector<1x8x8xf32> to vector<1x1x8x8xf32>
    %43 = vector.shape_cast %39 : vector<1x8x8xf32> to vector<1x1x8x8xf32>
    %44 = tpu.concatenate %40, %41, %42, %43 in 1 : vector<1x1x8x8xf32>, vector<1x1x8x8xf32>, vector<1x1x8x8xf32>, vector<1x1x8x8xf32> -> vector<1x4x8x8xf32>
    %45 = vector.shape_cast %34 : vector<1x4x8x8xf32> to vector<4x8x8xf32>
    %46 = vector.shape_cast %44 : vector<1x4x8x8xf32> to vector<4x8x8xf32>
    "tpu.trace_start"() <{level = 10 : i32, message = "gnm,gmd->gnd"}> : () -> ()
    %cst_18 = arith.constant dense<0.000000e+00> : vector<4x8x8xf32>
    %47 = tpu.matmul %45, %46, %cst_18 {dimension_numbers = #tpu.dot_dimension_numbers<[2], [1], [1], [2], [0, 0, 0, 1, 1, 2], [0], [0]>} : vector<4x8x8xf32>, vector<4x8x8xf32>, vector<4x8x8xf32> -> vector<4x8x8xf32>
    "tpu.trace_stop"() : () -> ()
    %48 = vector.shape_cast %47 : vector<4x8x8xf32> to vector<1x4x8x8xf32>
    %49 = vector.extract_strided_slice %48 {offsets = [0, 0, 0, 0], sizes = [1, 1, 8, 8], strides = [1, 1, 1, 1]} : vector<1x4x8x8xf32> to vector<1x1x8x8xf32>
    %50 = vector.shape_cast %49 : vector<1x1x8x8xf32> to vector<1x8x8xf32>
    %51 = vector.extract_strided_slice %48 {offsets = [0, 1, 0, 0], sizes = [1, 1, 8, 8], strides = [1, 1, 1, 1]} : vector<1x4x8x8xf32> to vector<1x1x8x8xf32>
    %52 = vector.shape_cast %51 : vector<1x1x8x8xf32> to vector<1x8x8xf32>
    %53 = vector.extract_strided_slice %48 {offsets = [0, 2, 0, 0], sizes = [1, 1, 8, 8], strides = [1, 1, 1, 1]} : vector<1x4x8x8xf32> to vector<1x1x8x8xf32>
    %54 = vector.shape_cast %53 : vector<1x1x8x8xf32> to vector<1x8x8xf32>
    %55 = vector.extract_strided_slice %48 {offsets = [0, 3, 0, 0], sizes = [1, 1, 8, 8], strides = [1, 1, 1, 1]} : vector<1x4x8x8xf32> to vector<1x1x8x8xf32>
    %56 = vector.shape_cast %55 : vector<1x1x8x8xf32> to vector<1x8x8xf32>
    %57 = tpu.concatenate %50, %52, %54, %56 in 2 : vector<1x8x8xf32>, vector<1x8x8xf32>, vector<1x8x8xf32>, vector<1x8x8xf32> -> vector<1x8x32xf32>
    %c0_19 = arith.constant 0 : index
    %c0_20 = arith.constant 0 : index
    %58 = vector.load %arg5[%c0_19, %c0_20] : memref<1x64xf32, #tpu.memory_space<vmem>>, vector<1x64xf32>
    %59 = vector.extract_strided_slice %58 {offsets = [0, 0], sizes = [1, 32], strides = [1, 1]} : vector<1x64xf32> to vector<1x32xf32>
    %60 = vector.shape_cast %59 : vector<1x32xf32> to vector<1x1x32xf32>
    %61 = vector.broadcast %60 : vector<1x1x32xf32> to vector<1x8x32xf32>
    %62 = arith.addf %57, %61 : vector<1x8x32xf32>
    %cst_21 = arith.constant 0.000000e+00 : f32
    %63 = vector.broadcast %cst_21 : f32 to vector<1x8x32xf32>
    %64 = arith.cmpf ogt, %62, %63 : vector<1x8x32xf32>
    %cst_22 = arith.constant 0.000000e+00 : f32
    %65 = vector.broadcast %cst_22 : f32 to vector<1x8x32xf32>
    %66 = arith.minimumf %62, %65 : vector<1x8x32xf32>
    %67 = math.exp %66 : vector<1x8x32xf32>
    %cst_23 = arith.constant 1.000000e+00 : f32
    %68 = vector.broadcast %cst_23 : f32 to vector<1x8x32xf32>
    %69 = arith.subf %67, %68 : vector<1x8x32xf32>
    %70 = arith.select %64, %62, %69 : vector<1x8x32xi1>, vector<1x8x32xf32>
    %71 = arith.mulf %15, %70 : vector<1x8x32xf32>
    %cst_24 = arith.constant 1.000000e+00 : f32
    %72 = vector.broadcast %cst_24 : f32 to vector<1x8x32xf32>
    %73 = arith.subf %72, %15 : vector<1x8x32xf32>
    %74 = arith.mulf %73, %0 : vector<1x8x32xf32>
    %75 = arith.addf %71, %74 : vector<1x8x32xf32>
    %76 = vector.shape_cast %75 : vector<1x8x32xf32> to vector<1x1x256xf32>
    %c0_25 = arith.constant 0 : index
    %c0_26 = arith.constant 0 : index
    %c0_27 = arith.constant 0 : index
    %77 = vector.load %arg6[%c0_25, %c0_26, %c0_27] : memref<1x1x256xf32, #tpu.memory_space<vmem>>, vector<1x1x256xf32>
    tpu.vector_store %arg6[%c0_25, %c0_26, %c0_27], %76 {strides = array<i32>} : memref<1x1x256xf32, #tpu.memory_space<vmem>>, vector<1x1x256xf32>,
    return
  }
  func.func @transform_0(%arg0: i32) -> (i32, i32, i32) {
    %c0_i32 = arith.constant 0 : i32
    %c0_i32_0 = arith.constant 0 : i32
    %c0_i32_1 = arith.constant 0 : i32
    return %arg0, %c0_i32, %c0_i32_0 : i32, i32, i32
  }
  func.func @transform_1(%arg0: i32) -> (i32, i32, i32, i32) {
    %c0_i32 = arith.constant 0 : i32
    %c0_i32_0 = arith.constant 0 : i32
    %c0_i32_1 = arith.constant 0 : i32
    %c0_i32_2 = arith.constant 0 : i32
    return %arg0, %c0_i32, %c0_i32_0, %c0_i32_1 : i32, i32, i32, i32
  }
  func.func @transform_2(%arg0: i32) -> (i32, i32, i32) {
    %c0_i32 = arith.constant 0 : i32
    %c0_i32_0 = arith.constant 0 : i32
    %c0_i32_1 = arith.constant 0 : i32
    return %arg0, %c0_i32, %c0_i32_0 : i32, i32, i32
  }
  func.func @transform_3(%arg0: i32) -> (i32, i32) {
    %c0_i32 = arith.constant 0 : i32
    %c0_i32_0 = arith.constant 0 : i32
    %c0_i32_1 = arith.constant 0 : i32
    return %c0_i32, %c0_i32_0 : i32, i32
  }
  func.func @transform_4(%arg0: i32) -> (i32, i32) {
    %c0_i32 = arith.constant 0 : i32
    %c0_i32_0 = arith.constant 0 : i32
    %c0_i32_1 = arith.constant 0 : i32
    return %c0_i32, %c0_i32_0 : i32, i32
  }
  func.func @transform_5(%arg0: i32) -> (i32, i32, i32) {
    %c0_i32 = arith.constant 0 : i32
    %c0_i32_0 = arith.constant 0 : i32
    %c0_i32_1 = arith.constant 0 : i32
    return %arg0, %c0_i32, %c0_i32_0 : i32, i32, i32
  }
}

</mosaic_0001>

<bundles_post_ra>
// kernel: tpu_custom_call.1
= control target key start
LH: loop header
LB: loop body
LE: loop exit
PB: predicated region body
PF: predicated region fallthrough
CT: control target
= control target key end

     0   :  { %s1860_s0 = inlined_call_operand.hbm [shape: f32[2,8,32], index: 0, kind: input, shape index: {}]   ;;  %s1861_s1 = inlined_call_operand.hbm [shape: bf16[2,4,8,8], index: 1, kind: input, shape index: {}]   ;;  %s1862_s2 = inlined_call_operand.hbm [shape: f32[2,8,8], index: 2, kind: input, shape index: {}]   ;;  %s1863_s3 = inlined_call_operand.hbm [shape: f32[32,64], index: 3, kind: input, shape index: {}]   ;;  %s1864_s4 = inlined_call_operand.vmem [shape: f32[1,64], index: 4, kind: input, shape index: {}]   ;;  %s1865_s5 = inlined_call_operand.hbm [shape: f32[2,1,256], index: 5, kind: output, shape index: {}]  }
   0x1   :  { %1881 = sst [smem:[#allocation19_spill]] %s1861_s1 }
   0x2   :  { %10 = vsyncpa [#allocation3], 0 }
   0x3   :  { %12 = vsyncpa [#allocation3 + $0x1], 0 }
   0x4   :  { %13 = vsyncpa [#allocation6], 0 }
   0x5   :  { %15 = vsyncpa [#allocation6 + $0x1], 0 }
   0x6   :  { %16 = vsyncpa [#allocation9], 0 }
   0x7   :  { %17 = vsyncpa [#allocation4], 0 }
   0x8   :  { %19 = vsyncpa [#allocation4 + $0x1], 0  ;;  %s1521_s18 = smov 0   ;;  %s1523_s19 = smov 0  }
   0x9   :  { %s1525_s20 = smov 0   ;;  %s1527_s21 = smov 0  }
   0xa LB: > { %1882 = sst [smem:[#allocation15_spill]] %s1461_s20  ;;  %s1542_s22 = sadd.s32 1, %s1465_s21   ;;  %s1465_s21 = sphi %s1527_s21, %s1908_s21   ;;  %s1461_s20 = sphi %s1525_s20, %s1910_s20   ;;  %s1457_s19 = sphi %s1523_s19, %s1912_s19   ;;  %s1453_s18 = sphi %s1521_s18, %s1911_s18  }
   0xb   : > { %1883 = sst [smem:[#allocation16_spill]] %s1542_s22  ;;  %s32_s23 = sadd.s32 1, %s1461_s20 }
   0xc   : > { %s29_s24 = ssub.s32 %s1465_s21, %s1542_s22  ;;  %p1866_p0 = scmp.ne.s32.totalorder %s1461_s20, %s1457_s19 }
   0xd   : > { %p30_p1 = scmp.eq.s32.totalorder %s29_s24, 0  ;;  %p40_p2 = scmp.eq.s32.totalorder %s1465_s21, 0 }
   0xe   : > { %p1196_p4 = scmp.lt.s32.totalorder %s1465_s21, 2  ;;  %s1559_s26 = sand.u32 1, %s1461_s20  }
   0xf   : > { %s1553_s25 = scalar_select %p30_p1, %s1461_s20, %s32_s23  }
  0x10   : > { %p41_p5 = por %p40_p2, %p1866_p0  ;;  %s223_s27 = sand.u32 1, %s1465_s21  }
  0x11   : > { %1884 = sst [smem:[#allocation17_spill]] %s1553_s25  ;;  %s1079_s28 = sshll.u32 %s1559_s26, 4 }
  0x12   : > { %p1563_p6 = pnand %p1196_p4, %p41_p5  ;;  %s1104_s30 = sshll.u32 %s1465_s21, 8 }
  0x13   : > { %s1886_s1 = sld [smem:[#allocation19_spill]]  ;;  %s227_s9 = scalar_lea.vmem [#allocation5], %s1079_s28 }
  0x14   : > { %s1885_s29 = scalar_select %p1563_p6, 1, 0 }
  0x15   : > { %s234_s10 = sshll.u32 %s227_s9, 4  ;;  %s1575_s11 = scalar_lea.sflag [#allocation6], %s223_s27  ;;  %s1573_s10 = int_to_ptr.vmem [resolvable:$true] %s234_s10 }
  0x16   : > { %p1581_p8 = pneg %p1563_p6 }
  0x18   : > { %s1887_s13 = scalar_select %p1581_p8, 1, 0 }
  0x19   : > { %s1571_s8 = scalar_lea.hbm %s1886_s1, %s1104_s30  ;;  %s1278_s16 = scalar_lea.hbm %s1886_s1, 512 }
  0x1a   : > { %s1273_s12 = scalar_lea.hbm %s1571_s8, 256  ;;  %p1279_p11 = scmp.lt.u32.totalorder %s1571_s8, %s1886_s1 }
  0x1b   : > { %p1274_p7 = scmp.ne.s32.totalorder %s1571_s8, %s1273_s12  ;;  %p1280_p12 = scmp.lt.u32.totalorder %s1278_s16, %s1273_s12 }
  0x1c   : > { %p1282_p1 = scmp.lt.u32.totalorder %s1273_s12, %s1571_s8 }
  0x1d   : > { %p1276_p9 = pnand %p1581_p8, %p1274_p7  ;;  %p1281_p13 = por %p1280_p12, %p1279_p11 }
  0x1f   : > { %p1277_p10 = pneg %p1276_p9  ;;  %p1283_p2 = por %p1282_p1, %p1281_p13 }
  0x21   : > { %p1284_p4 = pnand %p1283_p2, %p1277_p10 }
  0x23   : > { %1287 = shalt.err (!%p1284_p4)
}
  0x24   : > { %s1288_s24 = scalar_lea.vmem %s1573_s10, 256  ;;  %s1467_s27 = smov [#allocation5]  }
  0x25   : > { %p1289_p5 = scmp.ne.s32.totalorder %s1573_s10, %s1288_s24  ;;  %s1293_s28 = sshll.u32 %s1467_s27, 4  ;;  %s1294_s28 = int_to_ptr.vmem [resolvable:$false] %s1293_s28 }
  0x26   : > { %s1295_s30 = scalar_lea.vmem %s1294_s28, 512  ;;  %p1296_p3 = scmp.lt.s32.totalorder %s1573_s10, %s1294_s28 }
  0x27   : > { %p1291_p7 = pnand %p1289_p5, %p1581_p8  ;;  %p1297_p0 = scmp.lt.s32.totalorder %s1295_s30, %s1288_s24 }
  0x29   : > { %p1292_p9 = pneg %p1291_p7  ;;  %p1298_p11 = por %p1297_p0, %p1296_p3 }
  0x2b   : > { %p1299_p12 = pnand %p1298_p11, %p1292_p9 }
  0x2d   : > { %1302 = shalt.err (!%p1299_p12)
}
  0x2e   : > { %s1468_s6 = smov 64   ;;  %s1469_s7 = smov 4  }
  0x2f   : > { %1187 = dma.hbm_to_vmem [thread:$0]  (!%p1563_p6), %s1571_s8, 256, %s1573_s10, %s1575_s11, %s1468_s6, %s1468_s6, %s1469_s7  }
  0x30   : > { %s1606_s9 = sadd.s32 4294967295, %s1465_s21   ;;  %s1073_s12 = sadd.s32 4294967294, %s1465_s21  }
  0x31   : > { %p45_p0 = scmp.ne.s32.totalorder %s1457_s19, %s1453_s18  ;;  %p1870_p3 = scmp.eq.s32.totalorder %s1606_s9, 0 }
  0x32   : > { %p163_p10 = scmp.eq.s32.totalorder %s1606_s9, 1  ;;  %p169_p13 = scmp.eq.s32.totalorder %s1073_s12, 1 }
  0x33   : > { %p1615_p1 = por %p1870_p3, %p45_p0  ;;  %p1074_p2 = scmp.ge.s32.totalorder %s1465_s21, 1 }
  0x34   : > { %p1889_p4 = scmp.ne.s32.totalorder %s1461_s20, %s1457_s19  ;;  %p1627_p7 = por %p169_p13, %p45_p0 }
  0x35   : > { %s1888_s14 = scalar_select %p1615_p1, 1, 0 }
  0x36   : > { %p1623_p5 = por %p163_p10, %p1889_p4  ;;  %p176_p9 = scmp.lt.s32.totalorder %s1465_s21, 3 }
  0x37   : > { %s1891_s10 = scalar_select %p1627_p7, 1, 0 }
  0x38   : > { %s1890_s8 = scalar_select %p1623_p5, 1, 0 }
  0x39   : > { %1892 = sst [smem:[#allocation18_spill]] %s1891_s10  ;;  %p1632_p11 = pnand %p1074_p2, %p176_p9 }
  0x3a   : > { %s1470_s16 = smov [#allocation8]   ;;  %s1878_s23 = sshll.u32 %s1559_s26, 3 }
  0x3b   : > { %s1893_s15 = scalar_select %p1632_p11, 1, 0 }
  0x3c   : > { %s188_s17 = sshll.u32 %s1470_s16, 4  ;;  %p1177_p12 = pneg %p1632_p11  ;;  %s1636_s17 = int_to_ptr.vmem [resolvable:$true] %s188_s17 }
  0x3d   : > { %s1879_s24 = sshll.u32 %s1465_s21, 7  ;;  %s209_s7 = scalar_lea.vmem [#allocation2], %s1878_s23 }
  0x3e   : > { %p1644_p10 = pnand %p1177_p12, %p1870_p3  ;;  %s1653_s6 = scalar_lea.hbm %s1860_s0, %s1879_s24 }
  0x3f   : > { %s216_s12 = sshll.u32 %s209_s7, 4  ;;  %s1303_s25 = scalar_lea.hbm %s1863_s3, 512  ;;  %s1657_s12 = int_to_ptr.vmem [resolvable:$true] %s216_s12 }
  0x40   : > { %p1304_p0 = scmp.ne.s32.totalorder %s1863_s3, %s1303_s25  ;;  %p1305_p13 = pneg %p1644_p10 }
  0x41   : > { %p1310_p9 = scmp.lt.u32.totalorder %s1303_s25, %s1863_s3 }
  0x42   : > { %p1306_p2 = pnand %p1305_p13, %p1304_p0 }
  0x44   : > { %p1307_p4 = pneg %p1306_p2 }
  0x46   : > { %p1312_p12 = pnand %p1310_p9, %p1307_p4 }
  0x48   : > { %1315 = shalt.err (!%p1312_p12)
}
  0x49   : > { %s1316_s7 = scalar_lea.vmem %s1636_s17, 512  ;;  %p1324_p1 = scmp.lt.s32.totalorder %s1636_s17, %s1636_s17 }
  0x4a   : > { %p1317_p3 = scmp.ne.s32.totalorder %s1636_s17, %s1316_s7  ;;  %p1325_p11 = scmp.lt.s32.totalorder %s1316_s7, %s1316_s7 }
  0x4c   : > { %p1319_p7 = pnand %p1317_p3, %p1305_p13  ;;  %p1326_p6 = por %p1325_p11, %p1324_p1 }
  0x4e   : > { %p1320_p5 = pneg %p1319_p7 }
  0x50   : > { %p1327_p8 = pnand %p1326_p6, %p1320_p5 }
  0x52   : > { %1330 = shalt.err (!%p1327_p8)
}
  0x53   : > { %s1471_s1 = smov 128   ;;  %s1472_s20 = smov 8  }
  0x54   : > { %1180 = dma.hbm_to_vmem [thread:$0]  (!%p1644_p10), %s1863_s3, 512, %s1636_s17, [#allocation9], %s1471_s1, %s1471_s1, %s1472_s20  }
  0x55   : > { %s206_s16 = scalar_lea.sflag [#allocation3], %s1559_s26  ;;  %s1331_s28 = scalar_lea.hbm %s1653_s6, 128 }
  0x56   : > { %p1332_p3 = scmp.ne.s32.totalorder %s1653_s6, %s1331_s28  ;;  %p1895_p6 = scmp.ne.s32.totalorder %s1887_s13, 0 }
  0x57   : > { %s1336_s23 = scalar_lea.hbm %s1860_s0, 256  ;;  %p1337_p5 = scmp.lt.u32.totalorder %s1653_s6, %s1860_s0 }
  0x58   : > { %p1334_p8 = pnand %p1332_p3, %p1895_p6  ;;  %p1338_p7 = scmp.lt.u32.totalorder %s1336_s23, %s1331_s28 }
  0x59   : > { %p1340_p0 = scmp.lt.u32.totalorder %s1331_s28, %s1653_s6 }
  0x5a   : > { %p1335_p1 = pneg %p1334_p8  ;;  %p1339_p11 = por %p1338_p7, %p1337_p5 }
  0x5c   : > { %p1341_p13 = por %p1340_p0, %p1339_p11 }
  0x5e   : > { %p1342_p2 = pnand %p1341_p13, %p1335_p1 }
  0x60   : > { %1345 = shalt.err (!%p1342_p2)
}
  0x61   : > { %s1346_s17 = scalar_lea.vmem %s1657_s12, 128  ;;  %s1473_s27 = smov [#allocation2]  }
  0x62   : > { %p1347_p10 = scmp.ne.s32.totalorder %s1657_s12, %s1346_s17  ;;  %s1351_s1 = sshll.u32 %s1473_s27, 4  ;;  %s1352_s1 = int_to_ptr.vmem [resolvable:$false] %s1351_s1 }
  0x63   : > { %s1353_s10 = scalar_lea.vmem %s1352_s1, 256  ;;  %p1354_p12 = scmp.lt.s32.totalorder %s1657_s12, %s1352_s1 }
  0x64   : > { %p1349_p4 = pnand %p1347_p10, %p1895_p6  ;;  %p1355_p3 = scmp.lt.s32.totalorder %s1353_s10, %s1346_s17 }
  0x66   : > { %p1350_p9 = pneg %p1349_p4  ;;  %p1356_p8 = por %p1355_p3, %p1354_p12 }
  0x68   : > { %p1357_p5 = pnand %p1356_p8, %p1350_p9 }
  0x6a   : > { %1360 = shalt.err (!%p1357_p5)
}
  0x6b   : > { %p1896_p1 = scmp.ne.s32.totalorder %s1885_s29, 0  ;;  %s1897_s23 = sshll.u32 %s1465_s21, 7 }
  0x6c   : > { %s1707_s22 = scalar_lea.hbm %s1862_s2, %s1897_s23  ;;  %s1898_s25 = sshll.u32 %s1559_s26, 3 }
  0x6d   : > { %1184 = dma.hbm_to_vmem [thread:$0]  (!%p1896_p1), %s1653_s6, 128, %s1657_s12, %s206_s16  }
  0x6e   : > { %s248_s28 = scalar_lea.vmem [#allocation7], %s1898_s25  ;;  %s1361_s7 = scalar_lea.hbm %s1707_s22, 128 }
  0x6f   : > { %s255_s30 = sshll.u32 %s248_s28, 4  ;;  %p1362_p7 = scmp.ne.s32.totalorder %s1707_s22, %s1361_s7  ;;  %s256_s30 = int_to_ptr.vmem [resolvable:$true] %s255_s30 }
  0x70   : > { %s1366_s16 = scalar_lea.hbm %s1862_s2, 256  ;;  %p1367_p13 = scmp.lt.u32.totalorder %s1707_s22, %s1862_s2 }
  0x71   : > { %p1364_p11 = pnand %p1362_p7, %p1895_p6  ;;  %p1368_p2 = scmp.lt.u32.totalorder %s1366_s16, %s1361_s7 }
  0x72   : > { %p1370_p4 = scmp.lt.u32.totalorder %s1361_s7, %s1707_s22 }
  0x73   : > { %p1365_p0 = pneg %p1364_p11  ;;  %p1369_p10 = por %p1368_p2, %p1367_p13 }
  0x75   : > { %p1371_p9 = por %p1370_p4, %p1369_p10 }
  0x77   : > { %p1372_p12 = pnand %p1371_p9, %p1365_p0 }
  0x79   : > { %1375 = shalt.err (!%p1372_p12)
}
  0x7a   : > { %s1376_s26 = scalar_lea.vmem %s256_s30, 128  ;;  %s1474_s1 = smov [#allocation7]  }
  0x7b   : > { %p1377_p3 = scmp.ne.s32.totalorder %s256_s30, %s1376_s26  ;;  %s1381_s10 = sshll.u32 %s1474_s1, 4  ;;  %s1382_s10 = int_to_ptr.vmem [resolvable:$false] %s1381_s10 }
  0x7c   : > { %s1383_s23 = scalar_lea.vmem %s1382_s10, 256  ;;  %p1384_p7 = scmp.lt.s32.totalorder %s256_s30, %s1382_s10 }
  0x7d   : > { %p1379_p8 = pnand %p1377_p3, %p1895_p6  ;;  %p1385_p11 = scmp.lt.s32.totalorder %s1383_s23, %s1376_s26 }
  0x7f   : > { %p1380_p5 = pneg %p1379_p8  ;;  %p1386_p1 = por %p1385_p11, %p1384_p7 }
  0x81   : > { %p1387_p2 = pnand %p1386_p1, %p1380_p5 }
  0x83   : > { %1390 = shalt.err (!%p1387_p2)
}
  0x84   : > { %p1899_p13 = scmp.ne.s32.totalorder %s1885_s29, 0  ;;  %p1900_p0 = scmp.ne.s32.totalorder %s1893_s15, 0 }
  0x85   : > { %s1732_s13 = sand.u32 (!%p1900_p0), 1, %s1457_s19   ;;  %p1901_p6 = scmp.ne.s32.totalorder (!%p1900_p0), %s1888_s14, 0 }
  0x86   : > { %1190 = dma.hbm_to_vmem [thread:$0]  (!%p1899_p13), %s1707_s22, 128, %s256_s30, %s1575_s11  }
  0x87   : > { %264 = sbr.rel (%p1900_p0) target bundleno = 1226 (0x4ca), region = 40  ;;  %s1085_s24 = sshll.u32 (!%p1900_p0), %s1732_s13, 3 }
  0x88   : > { %s267_s20 = scalar_lea.sflag (!%p1900_p0), [#allocation3], %s1732_s13  ;;  %s1736_s25 = scalar_lea.vmem (!%p1900_p0), [#allocation2], %s1085_s24 }
  0x8e   : > { %1436 = dma.done.wait (%p1901_p6), %s267_s20, 128  }
  0x8f   : > { %1438 = vsyncadd (%p1901_p6), %s267_s20, 4294967168  ;;  %s275_s29 = sand.u32 1, %s1606_s9   ;;  %s1086_s11 = sshll.u32 %s1732_s13, 4 }
  0x90   : > { %s276_s15 = scalar_lea.sflag [#allocation6], %s275_s29  ;;  %s279_s22 = scalar_lea.vmem [#allocation5], %s1086_s11 }
  0x91   : > { %1440 = dma.done.wait (%p1901_p6), %s276_s15, 384  }
  0x92   : > { %1442 = vsyncadd (%p1901_p6), %s276_s15, 4294966912  ;;  %s288_s28 = scalar_lea.vmem [#allocation7], %s1085_s24  ;;  %p1902_p1 = scmp.eq.s32.totalorder %s1606_s9, 0 }
  0x94   : > { %1444 = dma.done.wait (%p1902_p1), [#allocation9], 512   ;;  %p1903_p10 = pmov %p1902_p1 }
  0x95   : > { %v1475_v0 = vmov 0.0|0.0   ;;  %vm1476_vm0 = vmmov 0   ;;  %v1477_v1 = vmov 0.0   ;;  %v330_v2 = vld [vmem:[#allocation8] sm:$0xff]  ;;  %v331_v3 = vld [vmem:[#allocation8 + $0x8] sm:$0xff]  ;;  %v430_v7 = vld [vmem:[%s288_s28] sm:$0xff] }
  0x96   : > { %1446 = vsyncadd (%p1903_p10), [#allocation9], 4294966784  ;;  %1159 = vmatprep.subr.bf16.mxu0 %v1475_v0  ;;  %1136 = vmatprep.mubr.msk.f32.mxu0 %vm1476_vm0, %v1477_v1  ;;  %v1107_v4 = vld [vmem:[%s279_s22] sm:$0xff]   ;;  %v1160_v5 = vpack.c.bf16 %v331_v3, %v330_v2  ;;  %vm438_vm1 = vcmask 64512   ;;  %v333_v9 = vld [vmem:[#allocation8 + $0x18] sm:$0xff]  ;;  %vm431_vm2 = vcmp.gt.f32.partialorder %v430_v7, 0.0 }
  0x97   : > { %1139 = vmatprep.subr.mxu1 %v1477_v1  ;;  %1141 = vmatprep.mubr.msk.f32.mxu1 %vm1476_vm0, %v1477_v1  ;;  %v1108_v6 = vunpack.c.l.bf16 %v1107_v4  ;;  %v332_v8 = vld [vmem:[#allocation8 + $0x10] sm:$0xff]  ;;  %v1109_v10 = vunpack.c.h.bf16 %v1107_v4  ;;  %v1114_v12 = vld [vmem:[%s279_s22 + $0x8] sm:$0xff]   ;;  %vm334_vm3 = vcmask 261120   ;;  %s1478_s14 = smov 112   ;;  %s1479_s30 = smov 120   ;;  %vm798_vm4 = vcmask 130048  }
  0x98   : > { %v1163_v11 = vpack.c.bf16 %v333_v9, %v332_v8  ;;  %1161 = vmatpush3.bf16.msra.mxu0 %v1160_v5  ;;  %v1112_v14 = vunpack.c.l.bf16 %v1114_v12  ;;  %v1113_v16 = vunpack.c.h.bf16 %v1114_v12  ;;  %v1761_v22 = vld [vmem:[%s1736_s25] sm:$0xff]  ;;  %s1480_s7 = smov 104   ;;  %s1481_s6 = smov 8   ;;  %vm800_vm5 = vcmask 195584  }
  0x99   : > { %v434_v13 = vsel %vm431_vm2, %v1108_v6, -1e+09  ;;  %v435_v15 = vsel %vm431_vm2, %v1109_v10, -1e+09  ;;  %1162 = vmatprep.subr.bf16.mxu0 %v1475_v0  ;;  %s1482_s12 = smov 16   ;;  %s1483_s16 = smov 24  }
  0x9a   : > { %v439_v17 = vsel %vm438_vm1, %v434_v13, -inf  ;;  %v436_v18 = vsel %vm431_vm2, %v1112_v14, -1e+09  ;;  %v437_v19 = vsel %vm431_vm2, %v1113_v16, -1e+09  ;;  %v442_v21 = vsel %vm438_vm1, %v435_v15, -inf }
  0x9b   : > { %440 = vmax.xlane.f32.xlu0 %v439_v17  ;;  %v445_v20 = vsel %vm438_vm1, %v436_v18, -inf  ;;  %v448_v23 = vsel %vm438_vm1, %v437_v19, -inf  ;;  %s1484_s17 = smov 32   ;;  %s1485_s1 = smov 96   ;;  %vm905_vm7 = vcmask 523264   ;;  %vm907_vm8 = vcmask 785408  }
  0x9c   : > { %1164 = vmatpush3.bf16.msra.mxu0 %v1163_v11  ;;  %446 = vmax.xlane.f32.xlu1 %v445_v20  ;;  %v1091_v11 = vld [vmem:[%s1864_s4] ss:$0 sm:$0xff]  ;;  %s1488_s10 = smov 64   ;;  %s1089_s23 = sshll.u32 %s1732_s13, 1 }
  0x9d   : > { %1154 = vmatprep.subr.mxu0 %v1477_v1  ;;  %s1105_s24 = sshll.u32 %s1606_s9, 5  ;;  %s328_s20 = scalar_lea.vmem [#allocation10], %s1089_s23 }
  0x9e   : > { %s950_s25 = sshll.u32 %s328_s20, 4  ;;  %s1816_s15 = scalar_lea.hbm %s1865_s5, %s1105_s24  ;;  %s1818_s25 = int_to_ptr.vmem [resolvable:$true] %s950_s25 }
  0x9f   : > { %443 = vmax.xlane.f32.xlu0 %v442_v21  ;;  %1137 = vmatmul.mubr.msk.f32.vlgmr.msra.gmra.mrb[0].mxu0 %vm334_vm3, %v1761_v22  ;;  %s936_s22 = scalar_lea.sflag [#allocation4], %s1732_s13  ;;  %s1391_s28 = scalar_lea.vmem %s1818_s25, 32 }
  0xa0   : > { %449 = vmax.xlane.f32.xlu1 %v448_v23  ;;  %1156 = vmatprep.mubr.msk.f32.mxu0 %vm1476_vm0, %v1477_v1  ;;  %p1392_p4 = scmp.ne.s32.totalorder %s1818_s25, %s1391_s28  ;;  %p1904_p9 = scmp.ne.s32.totalorder %s1890_s8, 0 }
  0xa1   : > { %s1490_s9 = smov [#allocation10]  }
  0xa2   : > { %p1393_p12 = pnand %p1392_p4, %p1904_p9 }
  0xa4   : > { %p1394_p3 = pneg %p1393_p12 }
 0x128   : > { %v441_v24 = vpop.xlane.xlu0 %440 }
 0x129   : > { %v451_v25 = vsub.f32 %v434_v13, %v441_v24  ;;  %v447_v26 = vpop.xlane.xlu1 %446 }
 0x12a   : > { %v453_v28 = vsub.f32 %v436_v18, %v447_v26 }
 0x12b   : > { %v455_v27 = vmul.f32 1.442695, %v451_v25 }
 0x12c   : > { %v444_v29 = vpop.xlane.xlu0 %443  ;;  %v459_v30 = vmul.f32 1.442695, %v453_v28 }
 0x12d   : > { %1251 = vpow2.f32 %v455_v27  ;;  %v452_v31 = vsub.f32 %v435_v15, %v444_v29  ;;  %v450_v32 = vpop.xlane.xlu1 %449 }
 0x12e   : > { %1253 = vpow2.f32 %v459_v30  ;;  %v454_v34 = vsub.f32 %v437_v19, %v450_v32  ;;  %v1486_v30 = vmov 1983009808   ;;  %v835_v32 = vlaneseq }
 0x12f   : > { %v457_v33 = vmul.f32 1.442695, %v452_v31  ;;  %v833_v31 = vunpack.c.l.s4 %v1486_v30 }
 0x130   : > { %v461_v35 = vmul.f32 1.442695, %v454_v34  ;;  %vm932_vm9 = vcmp.lt.s32.totalorder %v835_v32, 256 }
 0x131   : > { %1255 = vpow2.f32 %v457_v33  ;;  %v1487_v33 = vmov 1934713408  }
 0x132   : > { %1257 = vpow2.f32 %v461_v35  ;;  %v848_v34 = vunpack.c.l.s4 %v1487_v33  ;;  %v834_v35 = vunpack.c.0.s8 %v833_v31 }
 0x137   : > { %v1252_v36 = vpop.eup %1251 }
 0x138   : > { %v463_v37 = vsel %vm438_vm1, %v1252_v36, 0.0  ;;  %v1254_v38 = vpop.eup %1253 }
 0x139   : > { %464 = vadd.xlane.f32.xlu0 %v463_v37  ;;  %v469_v39 = vsel %vm438_vm1, %v1254_v38, 0.0  ;;  %v849_v37 = vunpack.c.0.s8 %v848_v34 }
 0x13b   : > { %v1256_v40 = vpop.eup %1255 }
 0x13c   : > { %v466_v41 = vsel %vm438_vm1, %v1256_v40, 0.0  ;;  %v1258_v42 = vpop.eup %1257 }
 0x13d   : > { %470 = vadd.xlane.f32.xlu0 %v469_v39  ;;  %467 = vadd.xlane.f32.xlu1 %v466_v41  ;;  %v472_v43 = vsel %vm438_vm1, %v1258_v42, 0.0 }
 0x141   : > { %473 = vadd.xlane.f32.xlu1 %v472_v43 }
 0x172   : > { %v1773_v44 = vpop.f32.mrb[0].mxu0 }
 0x173   : > { %487 = vrot.lane.b32.xlu1 %v1773_v44, %s1478_s14  ;;  %484 = vrot.lane.b32.xlu0 %v1773_v44, %s1479_s30  ;;  %v1138_v45 = vpop.f32.mrb[1].mxu0  ;;  %v415_v19 = vadd.f32 %v1091_v11, %v1773_v44  ;;  %s1395_s14 = sshll.u32 %s1490_s9, 4  ;;  %s1396_s14 = int_to_ptr.vmem [resolvable:$false] %s1395_s14 }
 0x174   : > { %1140 = vmatpush3.msra.mxu1 %v1773_v44  ;;  %s1397_s30 = scalar_lea.vmem %s1396_s14, 64  ;;  %p1398_p8 = scmp.lt.s32.totalorder %s1818_s25, %s1396_s14 }
 0x175   : > { %1144 = vmatprep.subr.mxu1 %v1477_v1  ;;  %v1092_v20 = vmul.f32 -1.442695, %v415_v19  ;;  %p1399_p5 = scmp.lt.s32.totalorder %s1397_s30, %s1391_s28 }
 0x177   : > { %490 = vrot.lane.b32.xlu1 %v1773_v44, %s1480_s7  ;;  %p1400_p7 = por %p1399_p5, %p1398_p8 }
 0x179   : > { %p1401_p11 = pnand %p1400_p7, %p1394_p3 }
 0x1c6   : > { %v465_v46 = vpop.xlane.xlu0 %464 }
 0x1c7   : > { %1259 = vrcp.f32 %v465_v46 }
 0x1ca   : > { %v468_v49 = vpop.xlane.xlu1 %467  ;;  %v471_v50 = vpop.xlane.xlu0 %470 }
 0x1cb   : > { %1261 = vrcp.f32 %v468_v49 }
 0x1cc   : > { %1263 = vrcp.f32 %v471_v50 }
 0x1ce   : > { %v474_v51 = vpop.xlane.xlu1 %473 }
 0x1cf   : > { %1265 = vrcp.f32 %v474_v51 }
 0x1d1   : > { %v1260_v47 = vpop.eup %1259 }
 0x1d2   : > { %v476_v48 = vmul.f32 %v1260_v47, %v1252_v36  ;;  %v836_v36 = vshrl.u32 %v835_v32, 7 }
 0x1d4   : > { %1142 = vmatmul.mubr.msk.f32.vlgmr.msra.gmra.mrb[0].mxu1 %vm438_vm1, %v476_v48  ;;  %v852_v39 = vsub.s32 %v849_v37, %v836_v36 }
 0x1d5   : > { %1146 = vmatprep.mubr.msk.f32.mxu1 %vm1476_vm0, %v1477_v1  ;;  %v1262_v52 = vpop.eup %1261 }
 0x1d6   : > { %v1264_v53 = vpop.eup %1263  ;;  %v478_v54 = vmul.f32 %v1262_v52, %v1256_v40 }
 0x1d7   : > { %v480_v58 = vmul.f32 %v1264_v53, %v1254_v38  ;;  %v837_v38 = vsub.s32 %v834_v35, %v836_v36 }
 0x1d9   : > { %v1266_v57 = vpop.eup %1265 }
 0x1da   : > { %v482_v59 = vmul.f32 %v1266_v57, %v1258_v42 }
 0x1e5   : > { %v488_v55 = vpop.permute.xlu1 %487  ;;  %v485_v56 = vpop.permute.xlu0 %484 }
 0x1e6   : > { %1145 = vmatpush3.msra.mxu1 %v485_v56  ;;  %v1489_v56 = vmov 1966171168  }
 0x1e7   : > { %1147 = vmatmul.mubr.msk.f32.vlgmr.msra.gmra.mrb[2].mxu1 %vm438_vm1, %v478_v54  ;;  %1149 = vmatprep.subr.mxu1 %v1477_v1  ;;  %v916_v57 = vunpack.c.l.s4 %v1489_v56 }
 0x1e8   : > { %1150 = vmatpush3.msra.mxu1 %v488_v55  ;;  %1151 = vmatprep.mubr.msk.f32.mxu1 %vm1476_vm0, %v1477_v1 }
 0x1e9   : > { %v491_v60 = vpop.permute.xlu1 %490 }
 0x1ea   : > { %1155 = vmatpush3.msra.mxu0 %v491_v60  ;;  %v917_v60 = vunpack.c.0.s8 %v916_v57 }
 0x1eb   : > { %1152 = vmatmul.mubr.msk.f32.vlgmr.msra.gmra.mrb[4].mxu1 %vm438_vm1, %v480_v58  ;;  %1157 = vmatmul.mubr.msk.f32.vlgmr.msra.gmra.mrb[2].mxu0 %vm438_vm1, %v482_v59 }
 0x2a7   : > { %v562_v61 = vpop.f32.mrb[0].mxu1 }
 0x2a8   : > { %v1143_v62 = vpop.f32.mrb[1].mxu1 }
 0x2ba   : > { %v635_v63 = vpop.f32.mrb[2].mxu1 }
 0x2bb   : > { %786 = vrot.lane.b32.xlu1 %v635_v63, %s1481_s6  ;;  %v1148_v0 = vpop.f32.mrb[3].mxu1 }
 0x2be   : > { %v708_v2 = vpop.f32.mrb[4].mxu1  ;;  %v781_v3 = vpop.f32.mrb[2].mxu0 }
 0x2bf   : > { %790 = vrot.lane.b32.xlu0 %v708_v2, %s1482_s12  ;;  %v1153_v4 = vpop.f32.mrb[5].mxu1  ;;  %794 = vrot.lane.b32.xlu1 %v781_v3, %s1483_s16  ;;  %v1158_v5 = vpop.f32.mrb[3].mxu0  ;;  %v920_v2 = vsub.s32 %v917_v60, %v836_v36 }
 0x2c3   : > { %822 = vrot.lane.b32.xlu1 %v1761_v22, %s1484_s17 }
 0x32d   : > { %v787_v6 = vpop.permute.xlu1 %786 }
 0x32e   : > { %v797_v7 = vsel %vm438_vm1, %v562_v61, %v787_v6 }
 0x331   : > { %v791_v8 = vpop.permute.xlu0 %790  ;;  %v795_v9 = vpop.permute.xlu1 %794 }
 0x332   : > { %v799_v10 = vsel %vm798_vm4, %v797_v7, %v791_v8 }
 0x333   : > { %v801_v12 = vsel %vm800_vm5, %v799_v10, %v795_v9 }
 0x334   : > { %v809_v13 = vadd.f32 %v1091_v11, %v801_v12 }
 0x335   : > { %v823_v24 = vpop.permute.xlu1 %822 }
 0x336   : > { %v811_v14 = vmin.f32 %v809_v13, 0.0  ;;  %vm810_vm6 = vcmp.gt.f32.partialorder %v809_v13, 0.0 }
 0x338   : > { %v812_v15 = vmul.f32 1.442695, %v811_v14 }
 0x33a   : > { %1267 = vpow2.f32 %v812_v15 }
 0x33b   : > { %1269 = vpow2.f32 %v1092_v20 }
 0x344   : > { %v1268_v16 = vpop.eup %1267 }
 0x345   : > { %v1098_v17 = vadd.f32 -1.0, %v1268_v16  ;;  %v1270_v21 = vpop.eup %1269 }
 0x346   : > { %v419_v22 = vadd.f32 1.0, %v1270_v21 }
 0x347   : > { %v815_v18 = vsel %vm810_vm6, %v809_v13, %v1098_v17 }
 0x348   : > { %817 = vrot.lane.b32.xlu0 %v815_v18, %s1484_s17  ;;  %1271 = vrcp.f32 %v419_v22 }
 0x352   : > { %v1272_v23 = vpop.eup %1271 }
 0x353   : > { %v821_v25 = vsub.f32 1.0, %v1272_v23 }
 0x355   : > { %v825_v27 = vmul.f32 %v823_v24, %v821_v25 }
 0x3ba   : > { %v818_v26 = vpop.permute.xlu0 %817 }
 0x3bb   : > { %v820_v28 = vmul.f32 %v1272_v23, %v818_v26 }
 0x3bd   : > { %v826_v29 = vadd.f32 %v825_v27, %v820_v28 }
 0x3bf   : > { %828 = vrot.lane.b32.xlu0 %v826_v29, %s1485_s1 }
 0x431   : > { %v829_v40 = vpop.permute.xlu0 %828 }
 0x432   : > { %v831_v41 = vcombine.high %v829_v40, %v1477_v1  ;;  %v838_v42 = vrot.slane %v829_v40, %v837_v38 }
 0x434   : > { %v845_v43 = vrot.slane %v831_v41, %v837_v38  ;;  %v853_v44 = vrot.slane %v838_v42, %v852_v39  ;;  %v846_v45 = vcombine.high %v838_v42, %v1477_v1 }
 0x436   : > { %v868_v46 = vrot.slane %v845_v43, %v852_v39  ;;  %v876_v47 = vcombine.high %v853_v44, %v1477_v1  ;;  %v861_v48 = vcombine.high %v845_v43, %v1477_v1  ;;  %v860_v50 = vrot.slane %v846_v45, %v852_v39 }
 0x438   : > { %881 = vrot.lane.b32.xlu1 %v876_v47, %s1484_s17  ;;  %v878_v49 = vcombine.high %v868_v46, %v1477_v1  ;;  %v875_v51 = vrot.slane %v861_v48, %v852_v39  ;;  %v877_v52 = vcombine.high %v860_v50, %v1477_v1 }
 0x43a   : > { %893 = vrot.lane.b32.xlu0 %v878_v49, %s1484_s17  ;;  %v879_v53 = vcombine.high %v875_v51, %v1477_v1 }
 0x43c   : > { %885 = vrot.lane.b32.xlu1 %v860_v50, %s1488_s10 }
 0x43e   : > { %897 = vrot.lane.b32.xlu0 %v875_v51, %s1488_s10 }
 0x440   : > { %889 = vrot.lane.b32.xlu1 %v877_v52, %s1485_s1 }
 0x442   : > { %901 = vrot.lane.b32.xlu0 %v879_v53, %s1485_s1 }
 0x4aa   : > { %v882_v54 = vpop.permute.xlu1 %881 }
 0x4ab   : > { %v904_v62 = vsel %vm334_vm3, %v853_v44, %v882_v54 }
 0x4ac   : > { %v894_v55 = vpop.permute.xlu0 %893 }
 0x4ad   : > { %v909_v63 = vsel %vm334_vm3, %v868_v46, %v894_v55 }
 0x4ae   : > { %v886_v58 = vpop.permute.xlu1 %885 }
 0x4af   : > { %v906_v0 = vsel %vm905_vm7, %v904_v62, %v886_v58 }
 0x4b0   : > { %v898_v59 = vpop.permute.xlu0 %897 }
 0x4b1   : > { %v910_v1 = vsel %vm905_vm7, %v909_v63, %v898_v59 }
 0x4b2   : > { %v890_v61 = vpop.permute.xlu1 %889 }
 0x4b3   : > { %v908_v4 = vsel %vm907_vm8, %v906_v0, %v890_v61 }
 0x4b4   : > { %v902_v3 = vpop.permute.xlu0 %901 }
 0x4b5   : > { %v911_v5 = vsel %vm907_vm8, %v910_v1, %v902_v3 }
 0x4b6   : > { %v914_v6 = vcombine.low %v908_v4, %v911_v5 }
 0x4b8   : > { %v921_v7 = vrot.slane %v914_v6, %v920_v2 }
 0x4ba   : > { %v928_v8 = vrot.slane %v921_v7, %v920_v2 }
 0x4bc   : > { %934 = vst.msk [vmem:[%s328_s20] sm:$0x3] %vm932_vm9, %v928_v8 }
 0x4bd   : > { %1404 = shalt.err (!%p1401_p11)
}
 0x4be   : > { %s1405_s13 = scalar_lea.hbm %s1816_s15, 32  ;;  %s1409_s12 = scalar_lea.hbm %s1865_s5, 64 }
 0x4bf   : > { %p1406_p2 = scmp.ne.s32.totalorder %s1816_s15, %s1405_s13  ;;  %p1410_p6 = scmp.lt.u32.totalorder %s1816_s15, %s1865_s5 }
 0x4c0   : > { %p1411_p1 = scmp.lt.u32.totalorder %s1409_s12, %s1405_s13  ;;  %p1413_p4 = scmp.lt.u32.totalorder %s1405_s13, %s1816_s15 }
 0x4c1   : > { %p1407_p13 = pnand %p1406_p2, %p1904_p9 }
 0x4c2   : > { %p1412_p10 = por %p1411_p1, %p1410_p6 }
 0x4c3   : > { %p1408_p0 = pneg %p1407_p13 }
 0x4c4   : > { %p1414_p12 = por %p1413_p4, %p1412_p10 }
 0x4c6   : > { %p1415_p3 = pnand %p1414_p12, %p1408_p0 }
 0x4c8   : > { %1418 = shalt.err (!%p1415_p3)
}
 0x4c9   : > { %1175 = dma.vmem_to_hbm [thread:$0]  (%p1904_p9), %s1818_s25, 32, %s1816_s15, %s936_s22  }
 0x4ca PF: > { %s1905_s27 = sld [smem:[#allocation18_spill]]  ;;  %s962_s26 = sand.u32 1, %s1453_s18  }
 0x4cb   : > { %p1907_p5 = scmp.ge.s32.totalorder %s1465_s21, 2  ;;  %s963_s1 = scalar_lea.sflag [#allocation4], %s962_s26 }
 0x4d0   : > { %p1906_p8 = scmp.ne.s32.totalorder %s1905_s27, 0 }
 0x4d2   : > { %p1192_p7 = pnand %p1907_p5, %p1906_p8 }
 0x4d4   : > { %1448 = dma.done.wait (!%p1192_p7), %s963_s1, 32  }
 0x4d5   : > { %1450 = vsyncadd (!%p1192_p7), %s963_s1, 4294967264  ;;  %s1908_s21 = sld [smem:[#allocation16_spill]]  ;;  %s1909_s10 = sld [smem:[#allocation15_spill]] }
 0x4d6   : > { %s1910_s20 = sld [smem:[#allocation17_spill]]  ;;  %s1911_s18 = smov %s1457_s19 }
 0x4db   : > { %p22_p11 = scmp.ge.s32.totalorder %s1908_s21, 4   ;;  %s1912_s19 = smov %s1909_s10 }
 0x4dd   :  { %24 = sbr.rel (!%p22_p11) target bundleno = 10 (0xa), region = 113 }
 0x4e4   :  { %968 = vsyncpa [#allocation3], 1 }
 0x4e5   :  { %970 = vsyncpa [#allocation3 + $0x1], 1 }
 0x4e6   :  { %971 = vsyncpa [#allocation6], 1 }
 0x4e7   :  { %973 = vsyncpa [#allocation6 + $0x1], 1 }
 0x4e8   :  { %974 = vsyncpa [#allocation9], 1 }
 0x4e9   :  { %975 = vsyncpa [#allocation4], 1 }
 0x4ea   :  { %977 = vsyncpa [#allocation4 + $0x1], 1 }

</bundles_post_ra>
